<compile_context>
chip_gen: v5e
topology: v5e:2x2
jax: 0.10.0
libtpu: 0.0.40
codegen_flags: <defaults>
</compile_context>

<pallas_src>
import jax
import jax.numpy as jnp
from jax.experimental import pallas as pl
from jax.experimental.pallas import tpu as pltpu

_TB = 1024  # batch rows per tile for the gridded path


def _mean_kernel(x_ref, w_ref, b_ref, o_ref):
    # mean = x @ W + b  (MXU matmul, f32 accumulation; bias broadcast on VPU)
    acc = jnp.dot(x_ref[...], w_ref[...], preferred_element_type=jnp.float32)
    o_ref[...] = (acc + b_ref[...]).astype(o_ref.dtype)


def continuous_policy_forward(state, w, b2d, log_std):
    """state: [B, H] f32
    w:     [H, A] f32  (torch Linear weight, transposed)
    b2d:   [1, A] f32  (bias, pre-reshaped once at init)
    log_std: [A] f32
    returns (mean [B, A], std [A])"""
    B, H = state.shape
    A = w.shape[1]

    if B <= _TB:
        # Single-block fast path: whole arrays in VMEM, no grid machinery.
        mean = pl.pallas_call(
            _mean_kernel,
            out_shape=jax.ShapeDtypeStruct((B, A), state.dtype),
        )(state, w, b2d)
    else:
        # Tiled path: ragged last tile (no wrapper-side padding); rows past B
        # are never written back.  Block last dims equal the full array dims
        # (H, A), satisfying the (8,128) BlockSpec rule; _TB is a multiple of 8.
        grid = pl.cdiv(B, _TB)
        mean = pl.pallas_call(
            _mean_kernel,
            out_shape=jax.ShapeDtypeStruct((B, A), state.dtype),
            grid=(grid,),
            in_specs=[
                pl.BlockSpec((_TB, H), lambda i: (i, 0)),   # state tile (pipelined)
                pl.BlockSpec((H, A), lambda i: (0, 0)),     # weight: VMEM-resident
                pl.BlockSpec((1, A), lambda i: (0, 0)),     # bias:   VMEM-resident
            ],
            out_specs=pl.BlockSpec((_TB, A), lambda i: (i, 0)),
            compiler_params=pltpu.CompilerParams(
                dimension_semantics=("parallel",),
            ),
        )(state, w, b2d)

    # state-independent; plain JAX (XLA fuses it), no extra kernel output DMA.
    std = jnp.exp(log_std)
    return mean, std


def init_params(key, state_dim, action_dim, hidden_sizes=(32, 32)):
    """Synthetic init matching the PyTorch module's shapes.
    mean_net: Linear(prev_dim=hidden_sizes[-1], action_dim); log_std: zeros.
    Bias is returned pre-reshaped to (1, A) so forward() does no per-call
    reshape/pad work."""
    prev_dim = hidden_sizes[-1] if len(hidden_sizes) > 0 else state_dim
    kw, kb = jax.random.split(key)
    bound = 1.0 / jnp.sqrt(prev_dim)
    # stored transposed: [in_features, out_features]
    w = jax.random.uniform(kw, (prev_dim, action_dim), jnp.float32, -bound, bound)
    b2d = jax.random.uniform(kb, (1, action_dim), jnp.float32, -bound, bound)
    log_std = jnp.zeros((action_dim,), jnp.float32)
    return w, b2d, log_std


if __name__ == "__main__":
    key = jax.random.PRNGKey(0)
    k_params, k_state, k_state_big = jax.random.split(key, 3)

    state_dim = 32          # unused by forward (dead code in reference module)
    hidden_sizes = (32, 32)
    action_dim = 8
    batch = 4

    w, b2d, log_std = init_params(k_params, state_dim, action_dim, hidden_sizes)
    # forward() feeds `state` straight into mean_net, so its feature dim must
    # equal hidden_sizes[-1] (reproducing the reference module exactly).
    state = jax.random.normal(k_state, (batch, hidden_sizes[-1]), jnp.float32)

    mean, std = continuous_policy_forward(state, w, b2d, log_std)
    jax.block_until_ready((mean, std))

    # Reference check in plain JAX (small-batch / single-block path).
    mean_ref = state @ w + b2d
    std_ref = jnp.exp(log_std)
    assert mean.shape == (batch, action_dim)
    assert std.shape == (action_dim,)
    assert jnp.allclose(mean, mean_ref, atol=1e-5, rtol=1e-5)
    assert jnp.allclose(std, std_ref, atol=1e-6, rtol=1e-6)

    # Also exercise the gridded path with a ragged last tile (B not a multiple
    # of the tile size) to validate the no-padding writeback masking.
    big_batch = _TB + 37
    state_big = jax.random.normal(k_state_big, (big_batch, hidden_sizes[-1]),
                                  jnp.float32)
    mean_big, _ = continuous_policy_forward(state_big, w, b2d, log_std)
    jax.block_until_ready(mean_big)
    mean_big_ref = state_big @ w + b2d
    assert mean_big.shape == (big_batch, action_dim)
    assert jnp.allclose(mean_big, mean_big_ref, atol=1e-4, rtol=1e-4)

    print("KERNEL_OK")
</pallas_src>

<mosaic_0001>
module attributes {stable_mosaic.version = 11 : i64} {
  func.func @_mean_kernel(%arg0: memref<4x32xf32, #tpu.memory_space<vmem>>, %arg1: memref<32x8xf32, #tpu.memory_space<vmem>>, %arg2: memref<1x8xf32, #tpu.memory_space<vmem>>, %arg3: memref<4x8xf32, #tpu.memory_space<vmem>>) attributes {dimension_semantics = [], scalar_prefetch = 0 : i64, scratch_operands = 0 : i64, tpu.core_type = #tpu.core_type<tc>} {
    %c0 = arith.constant 0 : index
    %c0_0 = arith.constant 0 : index
    %0 = vector.load %arg0[%c0, %c0_0] : memref<4x32xf32, #tpu.memory_space<vmem>>, vector<4x32xf32>
    %c0_1 = arith.constant 0 : index
    %c0_2 = arith.constant 0 : index
    %1 = vector.load %arg1[%c0_1, %c0_2] : memref<32x8xf32, #tpu.memory_space<vmem>>, vector<32x8xf32>
    %cst = arith.constant dense<0.000000e+00> : vector<4x8xf32>
    %2 = tpu.matmul %0, %1, %cst {dimension_numbers = #tpu.dot_dimension_numbers<[1], [0], [0], [1], [0, 0, 1, 1], [], []>} : vector<4x32xf32>, vector<32x8xf32>, vector<4x8xf32> -> vector<4x8xf32>
    %c0_3 = arith.constant 0 : index
    %c0_4 = arith.constant 0 : index
    %3 = vector.load %arg2[%c0_3, %c0_4] : memref<1x8xf32, #tpu.memory_space<vmem>>, vector<1x8xf32>
    %4 = vector.broadcast %3 : vector<1x8xf32> to vector<4x8xf32>
    %5 = arith.addf %2, %4 : vector<4x8xf32>
    %c0_5 = arith.constant 0 : index
    %c0_6 = arith.constant 0 : index
    %6 = vector.load %arg3[%c0_5, %c0_6] : memref<4x8xf32, #tpu.memory_space<vmem>>, vector<4x8xf32>
    tpu.vector_store %arg3[%c0_5, %c0_6], %5 {strides = array<i32>} : memref<4x8xf32, #tpu.memory_space<vmem>>, vector<4x8xf32>,
    return
  }
}

</mosaic_0001>

<bundles_post_ra>
// kernel: tpu_custom_call.1
= control target key start
LH: loop header
LB: loop body
LE: loop exit
PB: predicated region body
PF: predicated region fallthrough
CT: control target
= control target key end

     0   :  { %s137_s0 = inlined_call_operand.vmem [shape: f32[4,32], index: 0, kind: input, shape index: {}]   ;;  %s138_s1 = inlined_call_operand.vmem [shape: f32[32,8], index: 1, kind: input, shape index: {}]   ;;  %s139_s2 = inlined_call_operand.vmem [shape: f32[1,8], index: 2, kind: input, shape index: {}]   ;;  %s140_s3 = inlined_call_operand.hbm [shape: f32[4,8], index: 3, kind: output, shape index: {}]  }
   0x1   :  { %v19_v0 = vld [vmem:[%s138_s1 + $0x18] sm:$0xff]  ;;  %v18_v1 = vld [vmem:[%s138_s1 + $0x10] sm:$0xff]  ;;  %v17_v2 = vld [vmem:[%s138_s1 + $0x8] sm:$0xff] }
   0x2   :  { %40 = vmatpush.msra.mxu0 %v19_v0 }
   0x3   :  { %8 = vsyncpa [#allocation3], 0  ;;  %v16_v3 = vld [vmem:[%s138_s1] sm:$0xff]  ;;  %vm24_vm0 = vcmask 261120   ;;  %s95_s24 = smov [#allocation2]   ;;  %s57_s28 = sshll.u32 %s140_s3, 4  ;;  %s58_s28 = int_to_ptr.hbm [resolvable:$true] %s57_s28 }
   0x4   :  { %41 = vmatpush.msra.mxu0 %v18_v1  ;;  %v15_v4 = vld [vmem:[%s137_s0] sm:$0xf]  ;;  %s55_s25 = sshll.u32 %s95_s24, 4  ;;  %vm48_vm1 = vcmask 60416   ;;  %s56_s25 = int_to_ptr.vmem [resolvable:$true] %s55_s25 }
   0x5   :  { %v68_v5 = vld [vmem:[%s139_s2] ss:$0 sm:$0xff] }
   0x6   :  { %42 = vmatpush.msra.mxu0 %v17_v2 }
   0x8   :  { %43 = vmatpush.msra.mxu0 %v16_v3 }
   0x9   :  { %66 = vmatmul.msk.f32.vlgmr.msra.gmra.mxu0 %vm24_vm0, %v15_v4 }
  0x86   :  { %v45_v6 = vpop.f32.mrf.mxu0 }
  0x87   :  { %v46_v7 = vadd.f32 %v68_v5, %v45_v6 }
  0x89   :  { %49 = vst.msk [vmem:[#allocation2] sm:$0xf] %vm48_vm1, %v46_v7 }
  0x8a   :  { %60 = dma.vmem_to_hbm [thread:$0]  %s56_s25, 64, %s58_s28, [#allocation3]  }
  0x8b   :  { %93 = dma.done.wait [#allocation3], 64  }
  0x8c   :  { %94 = vsyncadd [#allocation3], 4294967232 }
  0x8d   :  { %65 = vsyncpa [#allocation3], 1 }

</bundles_post_ra>
